<compile_context>
chip_gen: v6e
topology: v6e:2x2x1
jax: 0.10.0
libtpu: 0.0.40
codegen_flags: <defaults>
</compile_context>

<pallas_src>
import functools

import jax
import jax.numpy as jnp
from jax.experimental import pallas as pl
from jax.experimental.pallas import tpu as pltpu

PADDING = 6          # fixed by the module (padding=6 in AvgPool1d)
LANE = 128
SUBLANE = 8
_VMEM_TILE_BUDGET = 20 * 1024 * 1024   # per-step working set target
_VMEM_LIMIT = 32 * 1024 * 1024         # explicit scoped-VMEM limit (<= v7x 64 MiB)


def _cdiv(a, b):
    return (a + b - 1) // b


def _round_up(a, b):
    return _cdiv(a, b) * b


def _moving_avg_kernel(x_ref, o_ref, *, M, kernel_size, stride, inv_k,
                       fold_scale, row_axis):
    """o_tile = (1/K) * A_tile @ x_tile, with A_tile generated in-kernel.

    x_ref: (L, tn)  input tile (lanes = B*C or C)
    o_ref: (tm, tn) output tile (rows = pooled steps, first step dropped)
    """
    tm = o_ref.shape[0]
    L = x_ref.shape[0]
    i = pl.program_id(row_axis)

    # Output row m (global) averages unpadded input positions
    # [ (m+1)*stride - PADDING, (m+1)*stride - PADDING + K ); taps in the
    # zero-padded region simply get A == 0 (count_include_pad=True divisor K).
    row = jax.lax.broadcasted_iota(jnp.int32, (tm, L), 0) + i * tm
    col = jax.lax.broadcasted_iota(jnp.int32, (tm, L), 1)
    start = (row + 1) * stride - PADDING
    in_band = (col >= start) & (col < start + kernel_size) & (row < M)

    if fold_scale:
        # f32 path: fold 1/K into A (kept in f32 -> no extra rounding).
        a = jnp.where(in_band, jnp.float32(inv_k), jnp.float32(0.0))
        acc = jnp.dot(a, x_ref[...], preferred_element_type=jnp.float32)
    else:
        # sub-32-bit path: A is exactly 0/1 in the input dtype (MXU-native),
        # 1/K applied once to the f32 accumulator.
        a = in_band.astype(x_ref.dtype)
        acc = jnp.dot(a, x_ref[...], preferred_element_type=jnp.float32)
        acc = acc * jnp.float32(inv_k)
    o_ref[...] = acc.astype(o_ref.dtype)


def _pick_row_tile(M):
    """Row tile: multiple of 8, <= 256, and >= 2 tiles when M allows (megacore)."""
    if M <= SUBLANE:
        return M                                   # full extent
    return min(256, _round_up(_cdiv(M, 2), SUBLANE))


def _fit_vmem(tm, tn, L):
    """Shrink (tm, tn) until the per-step working set fits the VMEM budget."""
    def est(a, b):
        # x double-buffer + out double-buffer + in-kernel band tile & temps
        return 4 * (2 * L * b + 2 * a * b + 3 * a * L)
    while est(tm, tn) > _VMEM_TILE_BUDGET and (tm > SUBLANE or tn > LANE):
        if tn > LANE:
            tn = max(LANE, (tn // 2) // LANE * LANE)
        else:
            tm = max(SUBLANE, (tm // 2) // SUBLANE * SUBLANE)
    # TODO(synk): for extremely long L, add a band-limited contraction axis
    # (only the (tm*stride + K)-wide L window per row tile); unnecessary for
    # dLinear-scale sequence lengths.
    return tm, tn


def _moving_avg_lane_fold(x, kernel_size, stride, M, inv_k, fold_scale):
    """C < 128: fold (B, C) into the lane axis."""
    B, L, C = x.shape
    N = B * C
    x_flat = jnp.transpose(x, (1, 0, 2)).reshape(L, N)   # (L, B*C), lane-dense

    tm = _pick_row_tile(M)
    tn = N if N <= 512 else 512
    tm, tn = _fit_vmem(tm, tn, L)
    grid = (_cdiv(N, tn), _cdiv(M, tm))   # rows innermost: X block stays resident

    kernel = functools.partial(
        _moving_avg_kernel, M=M, kernel_size=kernel_size, stride=stride,
        inv_k=inv_k, fold_scale=fold_scale, row_axis=1)

    out_flat = pl.pallas_call(
        kernel,
        out_shape=jax.ShapeDtypeStruct((M, N), x.dtype),
        grid=grid,
        in_specs=[pl.BlockSpec((L, tn), lambda j, i: (0, j))],
        out_specs=pl.BlockSpec((tm, tn), lambda j, i: (i, j)),
        compiler_params=pltpu.CompilerParams(
            dimension_semantics=("parallel", "parallel"),
            vmem_limit_bytes=_VMEM_LIMIT),
    )(x_flat)

    return jnp.transpose(out_flat.reshape(M, B, C), (1, 0, 2))


def _moving_avg_per_batch(x, kernel_size, stride, M, inv_k, fold_scale):
    """C >= 128: native layout, no wrapper transposes."""
    B, L, C = x.shape

    tm = _pick_row_tile(M)
    tc = C if C <= 512 else 512
    tm, tc = _fit_vmem(tm, tc, L)
    grid = (B, _cdiv(C, tc), _cdiv(M, tm))   # rows innermost: X block stays resident

    kernel = functools.partial(
        _moving_avg_kernel, M=M, kernel_size=kernel_size, stride=stride,
        inv_k=inv_k, fold_scale=fold_scale, row_axis=2)

    return pl.pallas_call(
        kernel,
        out_shape=jax.ShapeDtypeStruct((B, M, C), x.dtype),
        grid=grid,
        in_specs=[pl.BlockSpec((None, L, tc), lambda b, c, i: (b, 0, c))],
        out_specs=pl.BlockSpec((None, tm, tc), lambda b, c, i: (b, i, c)),
        compiler_params=pltpu.CompilerParams(
            dimension_semantics=("parallel", "parallel", "parallel"),
            vmem_limit_bytes=_VMEM_LIMIT),
    )(x)


def moving_avg(x, kernel_size, stride):
    """x: (B, L, C) -> (B, L_pool - 1, C), matching the torch module exactly."""
    B, L, C = x.shape
    L_pool = (L + 2 * PADDING - kernel_size) // stride + 1
    M = L_pool - 1                      # index_select drops the first pooled step
    assert M >= 1, "sequence too short for this kernel_size/stride"
    inv_k = 1.0 / kernel_size
    fold_scale = x.dtype == jnp.float32

    if C >= LANE:
        return _moving_avg_per_batch(x, kernel_size, stride, M, inv_k, fold_scale)
    return _moving_avg_lane_fold(x, kernel_size, stride, M, inv_k, fold_scale)


def _reference(x, kernel_size, stride):
    """Plain-JAX reference of the torch module (for correctness checks)."""
    B, L, C = x.shape
    xp = jnp.pad(x, ((0, 0), (PADDING, PADDING), (0, 0)))
    Lp = L + 2 * PADDING
    L_pool = (Lp - kernel_size) // stride + 1
    windows = jnp.stack(
        [xp[:, t * stride: t * stride + kernel_size, :] for t in range(L_pool)],
        axis=1,
    )  # (B, L_pool, K, C)
    pooled = windows.mean(axis=2)       # count_include_pad=True -> divide by K
    return pooled[:, 1:, :]             # index_select(dim=1, 1..L_pool-1)


if __name__ == "__main__":
    key = jax.random.PRNGKey(0)

    # 1) Base case consistent with the module's forward: (B=2, L=16, C=4).
    #    AvgPool1d requires padding <= kernel_size/2, so kernel_size >= 12.
    kernel_size, stride = 13, 1
    x = jax.random.normal(key, (2, 16, 4), dtype=jnp.float32)
    out = jax.block_until_ready(moving_avg(x, kernel_size, stride))
    ref = _reference(x, kernel_size, stride)
    assert out.shape == ref.shape, (out.shape, ref.shape)
    assert jnp.allclose(out, ref, atol=1e-5, rtol=1e-5)

    # 2) stride > 1 (absorbed into the in-kernel band).
    x2 = jax.random.normal(jax.random.PRNGKey(0), (3, 32, 4), dtype=jnp.float32)
    out2 = jax.block_until_ready(moving_avg(x2, 12, 2))
    ref2 = _reference(x2, 12, 2)
    assert out2.shape == ref2.shape, (out2.shape, ref2.shape)
    assert jnp.allclose(out2, ref2, atol=1e-5, rtol=1e-5)

    # 3) Wide-channel path (C >= 128): native layout, no wrapper transposes.
    x3 = jax.random.normal(jax.random.PRNGKey(0), (2, 16, 128), dtype=jnp.float32)
    out3 = jax.block_until_ready(moving_avg(x3, 13, 1))
    ref3 = _reference(x3, 13, 1)
    assert out3.shape == ref3.shape, (out3.shape, ref3.shape)
    assert jnp.allclose(out3, ref3, atol=1e-5, rtol=1e-5)

    print("KERNEL_OK")
</pallas_src>

<mosaic_0001>
module attributes {stable_mosaic.version = 11 : i64} {
  func.func @_moving_avg_kernel(%arg0: i32, %arg1: i32, %arg2: memref<16x8xf32, #tpu.memory_space<vmem>>, %arg3: memref<8x8xf32, #tpu.memory_space<vmem>>) attributes {dimension_semantics = [#tpu.dimension_semantics<parallel>, #tpu.dimension_semantics<parallel>], iteration_bounds = array<i64: 1, 2>, scalar_prefetch = 0 : i64, scratch_operands = 0 : i64, tpu.core_type = #tpu.core_type<tc>, window_params = [{transform_indices = @transform_0, window_bounds = array<i64: 16, 8>}, {transform_indices = @transform_1, window_bounds = array<i64: 8, 8>}]} {
    %0 = tpu.iota {dimensions = array<i32: 0>} : vector<8x16xi32>
    %c8_i32 = arith.constant 8 : i32
    %1 = arith.muli %arg1, %c8_i32 : i32
    %2 = vector.broadcast %1 : i32 to vector<8x16xi32>
    %3 = arith.addi %0, %2 : vector<8x16xi32>
    %4 = tpu.iota {dimensions = array<i32: 1>} : vector<8x16xi32>
    %c1_i32 = arith.constant 1 : i32
    %5 = vector.broadcast %c1_i32 : i32 to vector<8x16xi32>
    %6 = arith.addi %3, %5 : vector<8x16xi32>
    %c1_i32_0 = arith.constant 1 : i32
    %7 = vector.broadcast %c1_i32_0 : i32 to vector<8x16xi32>
    %8 = arith.muli %6, %7 : vector<8x16xi32>
    %c6_i32 = arith.constant 6 : i32
    %9 = vector.broadcast %c6_i32 : i32 to vector<8x16xi32>
    %10 = arith.subi %8, %9 : vector<8x16xi32>
    %11 = arith.cmpi sge, %4, %10 : vector<8x16xi32>
    %c13_i32 = arith.constant 13 : i32
    %12 = vector.broadcast %c13_i32 : i32 to vector<8x16xi32>
    %13 = arith.addi %10, %12 : vector<8x16xi32>
    %14 = arith.cmpi slt, %4, %13 : vector<8x16xi32>
    %15 = arith.andi %11, %14 : vector<8x16xi1>
    %c15_i32 = arith.constant 15 : i32
    %16 = vector.broadcast %c15_i32 : i32 to vector<8x16xi32>
    %17 = arith.cmpi slt, %3, %16 : vector<8x16xi32>
    %18 = arith.andi %15, %17 : vector<8x16xi1>
    %cst = arith.constant 0.0769230798 : f32
    %cst_1 = arith.constant 0.000000e+00 : f32
    %19 = vector.broadcast %cst : f32 to vector<8x16xf32>
    %20 = vector.broadcast %cst_1 : f32 to vector<8x16xf32>
    %21 = arith.select %18, %19, %20 : vector<8x16xi1>, vector<8x16xf32>
    %c0 = arith.constant 0 : index
    %c0_2 = arith.constant 0 : index
    %22 = vector.load %arg2[%c0, %c0_2] : memref<16x8xf32, #tpu.memory_space<vmem>>, vector<16x8xf32>
    %cst_3 = arith.constant dense<0.000000e+00> : vector<8x8xf32>
    %23 = tpu.matmul %21, %22, %cst_3 {dimension_numbers = #tpu.dot_dimension_numbers<[1], [0], [0], [1], [0, 0, 1, 1], [], []>} : vector<8x16xf32>, vector<16x8xf32>, vector<8x8xf32> -> vector<8x8xf32>
    %c0_4 = arith.constant 0 : index
    %c0_5 = arith.constant 0 : index
    %24 = vector.load %arg3[%c0_4, %c0_5] : memref<8x8xf32, #tpu.memory_space<vmem>>, vector<8x8xf32>
    tpu.vector_store %arg3[%c0_4, %c0_5], %23 {strides = array<i32>} : memref<8x8xf32, #tpu.memory_space<vmem>>, vector<8x8xf32>,
    return
  }
  func.func @transform_0(%arg0: i32, %arg1: i32) -> (i32, i32) {
    %c0_i32 = arith.constant 0 : i32
    %c0_i32_0 = arith.constant 0 : i32
    return %c0_i32, %arg0 : i32, i32
  }
  func.func @transform_1(%arg0: i32, %arg1: i32) -> (i32, i32) {
    %c0_i32 = arith.constant 0 : i32
    return %arg1, %arg0 : i32, i32
  }
}

</mosaic_0001>

<bundles_post_ra>
// kernel: tpu_custom_call.1
= control target key start
LH: loop header
LB: loop body
LE: loop exit
PB: predicated region body
PF: predicated region fallthrough
CT: control target
= control target key end

     0   :  { %s384_s6 = smov 0   ;;  %s386_s7 = smov 0   ;;  %s425_s0 = inlined_call_operand.vmem [shape: f32[16,8], index: 0, kind: input, shape index: {}]   ;;  %s426_s1 = inlined_call_operand.vmem [shape: f32[15,8], index: 1, kind: output, shape index: {}]  }
   0x1   :  { %s388_s8 = smov 0  }
   0x2 LB: > { %s20_s9 = sadd.s32 1, %s366_s7  ;;  %p305_p0 = scmp.ge.s32.totalorder %s370_s8, 1  ;;  %s370_s8 = sphi %s388_s8, %s11_s8   ;;  %s366_s7 = sphi %s386_s7, %s428_s7   ;;  %s362_s6 = sphi %s384_s6, %s427_s6  }
   0x3   : > { %p21_p1 = scmp.ge.s32.totalorder %s20_s9, 2  ;;  %p100_p2 = scmp.lt.s32.totalorder %s370_s8, 3 }
   0x5   : > { %s430_s9 = smov (%p21_p1, %s20_s9), 0  ;;  %p101_p3 = pnand %p305_p0, %p100_p2 }
   0x6   : > { %s307_s12 = sshll.u32 (!%p101_p3), %s362_s6, 3  ;;  %p125_p4 = scmp.lt.s32.totalorder (!%p101_p3), %s362_s6, 1 }
   0x7   : > { %104 = sbr.rel (%p101_p3) target bundleno = 223 (0xdf), region = 24 }
   0xc   : > { %v149_v0 = vld [vmem:[%s425_s0 + $0x8] sm:$0xff]  ;;  %v132_v1 = vlaneseq  ;;  %v372_v2 = vmov 0.0   ;;  %v148_v3 = vld [vmem:[%s425_s0] sm:$0xff]  ;;  %vm373_vm0 = vmmov 0   ;;  %v135_v4 = vstv %s307_s12  ;;  %s432_s6 = smov (!%p125_p4, %s362_s6), 1 }
   0xd   : > { %315 = vmatprep.subr.mxu0 %v372_v2  ;;  %319 = vmatprep.mubr.msk.f32.mxu0 %vm373_vm0, %v372_v2  ;;  %vm150_vm5 = vcmask 130048   ;;  %s306_s15 = sshll.u32 %s432_s6, 3  ;;  %vm224_vm7 = vcmask 64512  }
   0xe   : > { %316 = vmatpush3.msra.mxu0 %v149_v0  ;;  %v133_v5 = vshrl.u32 %v132_v1, 7  ;;  %v138_v7 = vand.u32 127, %v132_v1  ;;  %s131_s18 = scalar_lea.vmem %s426_s1, %s306_s15 }
   0xf   : > { %317 = vmatprep.subr.mxu0 %v372_v2 }
  0x10   : > { %318 = vmatpush3.msra.mxu0 %v148_v3  ;;  %v136_v6 = vadd.s32 %v135_v4, %v133_v5 }
  0x12   : > { %v139_v8 = vadd.s32 1, %v136_v6  ;;  %vm145_vm2 = vcmp.lt.s32.totalorder %v136_v6, 15 }
  0x14   : > { %v308_v9 = vadd.s32 4294967290, %v139_v8 }
  0x16   : > { %vm141_vm1 = vcmp.ge.s32.totalorder %v138_v7, %v308_v9  ;;  %v142_v10 = vadd.s32 13, %v308_v9 }
  0x18   : > { %vm143_vm3 = vcmp.lt.s32.totalorder %v138_v7, %v142_v10 }
  0x19   : > { %vm144_vm4 = vmand %vm141_vm1, %vm143_vm3 }
  0x1a   : > { %vm146_vm6 = vmand %vm144_vm4, %vm145_vm2 }
  0x1b   : > { %v147_v11 = vsel %vm146_vm6, 0.07692308, %v372_v2 }
  0x1c   : > { %320 = vmatmul.mubr.msk.f32.vlgmr.msra.gmra.mxu0 %vm150_vm5, %v147_v11 }
  0xdc   : > { %v220_v12 = vpop.f32.mrf.mxu0 }
  0xdd   : > { %225 = vst.msk [vmem:[%s131_s18] sm:$0xff] %vm224_vm7, %v220_v12 }
  0xde   : > { %v321_v13 = vpop.f32.mrf.mxu0 }
  0xdf PF: > { %s11_s8 = sadd.s32 1, %s370_s8   ;;  %s427_s6 = smov %s366_s7 }
  0xe0   : > { %p8_p5 = scmp.ge.s32.totalorder %s11_s8, 4   ;;  %s428_s7 = smov %s430_s9 }
  0xe2   :  { %10 = sbr.rel (!%p8_p5) target bundleno = 2 (0x2), region = 54 }

</bundles_post_ra>
